<compile_context>
chip_gen: v5e
topology: v5e:2x2
jax: 0.10.0
libtpu: 0.0.40
codegen_flags: <defaults>
</compile_context>

<pallas_src>
import random
from functools import partial

import jax
import jax.numpy as jnp
from jax import lax
from jax.experimental import pallas as pl
from jax.experimental.pallas import tpu as pltpu


# ---------------------------------------------------------------------------
# helpers
# ---------------------------------------------------------------------------
def _round_up(x, m):
    return -(-x // m) * m


def _padded_block_bytes(shape, itemsize):
    """Bytes of a VMEM block after (8, 128) tiling of the last two dims."""
    s = list(shape)
    if len(s) >= 1:
        s[-1] = _round_up(s[-1], 128)
    if len(s) >= 2:
        s[-2] = _round_up(s[-2], 8)
    n = 1
    for d in s:
        n *= int(d)
    return n * itemsize


def _device_vmem_capacity():
    try:
        return int(pltpu.get_tpu_info().vmem_capacity_bytes)
    except Exception:
        return 64 << 20                       # conservative fallback (v7x per-core)


def _vmem_limit(request_bytes):
    cap = _device_vmem_capacity()
    hi = max(32 << 20, cap - (12 << 20))      # leave headroom for Mosaic scratch
    return int(min(hi, max(32 << 20, int(request_bytes))))


def _buffered_spec(block_shape, index_map, depth=3):
    # deeper pipelining for the weight stream; fall back to default 2-deep.
    try:
        return pl.BlockSpec(block_shape, index_map, pipeline_mode=pl.Buffered(depth))
    except Exception:
        return pl.BlockSpec(block_shape, index_map)


def _choose_tk(pc, emb, target=8192, weight_budget=24 << 20):
    """Weight-tile width along the P*C axis: multiple of 128 dividing P*C,
    near `target` columns (~4 MiB bf16 at E=256), capped by a VMEM budget."""
    if pc <= 256 or pc % 128 != 0:
        return pc
    max_tk = max(128, weight_budget // (3 * 2 * emb))     # 3 bf16 buffers
    cands = [d for d in range(128, pc + 1, 128) if pc % d == 0 and d <= max_tk]
    if not cands:
        return pc
    goal = min(target, max_tk)
    return min(cands, key=lambda d: abs(d - goal))


# ---------------------------------------------------------------------------
# Kernel 1: squared SSD for every stride-1 window (pre-shifted crop, SMEM sample)
# ---------------------------------------------------------------------------
def _ssd_kernel(sflat_ref, crop_ref, out_ref):
    # sflat_ref: SMEM (B, pw*pw*C)  scalar-prefetched reference patch
    # crop_ref : VMEM (1, pw*pw*C, Nh_fix, Nw_fix) host pre-shifted search crop
    # out_ref  : VMEM (1, Nh_fix, Nw_fix) squared SSD per candidate
    b = pl.program_id(0)
    n = crop_ref.shape[1]
    crop = crop_ref.at[0]                    # (n, Nh, Nw) view, zero cost

    def body(i, acc):
        d = crop[i] - sflat_ref[b, i]        # SMEM scalar splat, no XLU extract
        return acc + d * d

    out_ref[0] = lax.fori_loop(0, n, body,
                               jnp.zeros(out_ref.shape[1:], jnp.float32))


def patch_ssd(crop_shifted, sample_flat):
    """crop_shifted (B, pw*pw*C, Nh, Nw) f32, sample_flat (B, pw*pw*C) f32
    -> (B, Nh, Nw) squared SSD."""
    B, n, nh, nw = crop_shifted.shape
    req = (2 * _padded_block_bytes((1, n, nh, nw), 4)
           + 2 * _padded_block_bytes((1, nh, nw), 4))
    grid_spec = pltpu.PrefetchScalarGridSpec(
        num_scalar_prefetch=1,
        grid=(B,),
        in_specs=[pl.BlockSpec((1, n, nh, nw), lambda b, s: (b, 0, 0, 0))],
        out_specs=pl.BlockSpec((1, nh, nw), lambda b, s: (b, 0, 0)),
    )
    return pl.pallas_call(
        _ssd_kernel,
        out_shape=jax.ShapeDtypeStruct((B, nh, nw), jnp.float32),
        grid_spec=grid_spec,
        compiler_params=pltpu.CompilerParams(
            dimension_semantics=("parallel",),
            vmem_limit_bytes=_vmem_limit(int(1.5 * req) + (2 << 20))),
    )(sample_flat, crop_shifted)


# ---------------------------------------------------------------------------
# Kernel 2: fused 2-layer MLP, lane-dense, weights streamed once (use_mlp=True)
# ---------------------------------------------------------------------------
def _mlp_kernel(x_ref, w_ref, b1_ref, b2_ref, out_ref, h_ref):
    # grid = (2, K): phase (0: accumulate x@w1, 1: h@w2^T + bias), weight tile k
    ph = pl.program_id(0)
    k = pl.program_id(1)
    last_k = pl.num_programs(1) - 1
    w_tile = w_ref[0, 0]                                   # (tk, E) bf16

    @pl.when(ph == 0)
    def _layer1():
        @pl.when(k == 0)
        def _init():
            h_ref[...] = jnp.zeros_like(h_ref)

        h_ref[...] += jnp.dot(x_ref[...].astype(w_tile.dtype), w_tile,
                              preferred_element_type=jnp.float32)

        @pl.when(k == last_k)
        def _finalize():
            h_ref[...] = jnp.maximum(h_ref[...] + b1_ref[...], 0.0)

        # keep every output block's write-back well defined during phase 0
        out_ref[...] = jnp.zeros_like(out_ref)

    @pl.when(ph == 1)
    def _layer2():
        h = h_ref[...].astype(w_tile.dtype)                # (B, E)
        y = lax.dot_general(h, w_tile, (((1,), (1,)), ((), ())),
                            preferred_element_type=jnp.float32)   # (B, tk)
        out_ref[...] = y + b2_ref[0]


def mlp_project(x_flat, w_stack, b1r, b2r, tk):
    """x_flat (B, P*C) f32, w_stack (2, K, tk, E) bf16, b1r (1, E) f32,
    b2r (K, 1, tk) f32 -> (B, P*C) f32 = Linear -> ReLU -> Linear."""
    B, PC = x_flat.shape
    K = PC // tk
    E = w_stack.shape[-1]
    req = (3 * _padded_block_bytes((1, 1, tk, E), 2)
           + 4 * _padded_block_bytes((B, tk), 4)
           + 2 * _padded_block_bytes((1, E), 4)
           + 2 * _padded_block_bytes((1, 1, tk), 4)
           + _padded_block_bytes((B, E), 4))
    # TODO(synk): on v7x the 2 TensorCores could split the E (or k) axis; kept
    # single-core "arbitrary" here since both axes carry sequential state.
    grid_spec = pltpu.PrefetchScalarGridSpec(
        num_scalar_prefetch=0,
        grid=(2, K),
        in_specs=[
            pl.BlockSpec((B, tk), lambda ph, k: (0, k * (1 - ph))),       # x (pinned in ph1)
            _buffered_spec((1, 1, tk, E), lambda ph, k: (ph, k, 0, 0), 3),  # weights
            pl.BlockSpec((1, E), lambda ph, k: (0, 0)),                    # b1
            pl.BlockSpec((1, 1, tk), lambda ph, k: (k, 0, 0)),             # b2
        ],
        out_specs=pl.BlockSpec((B, tk), lambda ph, k: (0, k)),
        scratch_shapes=[pltpu.VMEM((B, E), jnp.float32)],
    )
    return pl.pallas_call(
        _mlp_kernel,
        out_shape=jax.ShapeDtypeStruct((B, PC), jnp.float32),
        grid_spec=grid_spec,
        compiler_params=pltpu.CompilerParams(
            dimension_semantics=("arbitrary", "arbitrary"),
            vmem_limit_bytes=_vmem_limit(int(1.5 * req) + (2 << 20))),
    )(x_flat, w_stack, b1r, b2r)


# ---------------------------------------------------------------------------
# Kernel 3: fused DMA gather (feat stays in HBM) + L2 norm (use_mlp=False)
# ---------------------------------------------------------------------------
def _gather_norm_kernel(ids_ref, feat_ref, out_ref, xbuf, sem, *, hw):
    # ids_ref : SMEM (B, P) patch row indices (scalar prefetch)
    # feat_ref: HBM  (B*HW, C)  (memory_space=pl.ANY)
    # out_ref : VMEM (1, P, C)
    b = pl.program_id(0)
    P = xbuf.shape[0]

    @pl.loop(0, P)
    def _start(r):
        row = b * hw + ids_ref[b, r]
        pltpu.make_async_copy(feat_ref.at[pl.ds(row, 1), :],
                              xbuf.at[pl.ds(r, 1), :],
                              sem.at[r]).start()

    @pl.loop(0, P)
    def _wait(r):
        pltpu.make_async_copy(feat_ref.at[pl.ds(0, 1), :],
                              xbuf.at[pl.ds(r, 1), :],
                              sem.at[r]).wait()

    x = xbuf[...]
    ss = jnp.sum(x * x, axis=-1, keepdims=True)
    out_ref[0] = x / (jnp.sqrt(ss) + 1e-7)


def gather_l2norm(patch_id, feat_rs):
    """patch_id (B, P) i32, feat_rs (B, HW, C) f32 -> (B, P, C) gathered+normed."""
    B, HW, C = feat_rs.shape
    P = patch_id.shape[1]
    feat_flat = feat_rs.reshape(B * HW, C).astype(jnp.float32)
    req = 2 * _padded_block_bytes((1, P, C), 4) + 2 * _padded_block_bytes((P, C), 4)
    grid_spec = pltpu.PrefetchScalarGridSpec(
        num_scalar_prefetch=1,
        grid=(B,),
        in_specs=[pl.BlockSpec(memory_space=pl.ANY)],           # feature map stays in HBM
        out_specs=pl.BlockSpec((1, P, C), lambda b, ids: (b, 0, 0)),
        scratch_shapes=[pltpu.VMEM((P, C), jnp.float32),
                        pltpu.SemaphoreType.DMA((P,))],
    )
    return pl.pallas_call(
        partial(_gather_norm_kernel, hw=HW),
        out_shape=jax.ShapeDtypeStruct((B, P, C), jnp.float32),
        grid_spec=grid_spec,
        compiler_params=pltpu.CompilerParams(
            dimension_semantics=("parallel",),
            vmem_limit_bytes=_vmem_limit(int(1.5 * req) + (2 << 20))),
    )(patch_id.astype(jnp.int32), feat_flat)


# ---------------------------------------------------------------------------
# PatchSampleNonlocalOneGroup forward (JAX wrapper around the Pallas kernels)
# ---------------------------------------------------------------------------
class PatchSampleNonlocalOneGroup:
    def __init__(self, use_mlp=False, emb_ch=256, patch_w=4, search_size=40):
        self.use_mlp = use_mlp
        self.emb_ch = emb_ch
        self.patch_w = patch_w
        self.half_ = patch_w // 2
        self.search_size = search_size
        self.stride = 1
        self.mlp = {}

    def _create_mlp(self, patch_ids, inputs, id):
        # deterministic synthetic init (uniform +/- 1/sqrt(fan_in), nn.Linear shapes)
        key = jax.random.PRNGKey(42)
        layers = []
        P = int(patch_ids.shape[1])
        for feat in inputs:
            input_nc = int(feat.shape[1]) * P
            key, k1, k2, k3, k4 = jax.random.split(key, 5)
            s1 = 1.0 / (input_nc ** 0.5)
            s2 = 1.0 / (self.emb_ch ** 0.5)
            w1 = jax.random.uniform(k1, (input_nc, self.emb_ch), jnp.float32, -s1, s1)
            b1 = jax.random.uniform(k2, (self.emb_ch,), jnp.float32, -s1, s1)
            w2 = jax.random.uniform(k3, (self.emb_ch, input_nc), jnp.float32, -s2, s2)
            b2 = jax.random.uniform(k4, (input_nc,), jnp.float32, -s2, s2)
            tk = _choose_tk(input_nc, self.emb_ch)
            K = input_nc // tk
            # w1 tiles and transposed w2 tiles share the (tk, E) shape so both
            # phases stream identically shaped bf16 blocks (f32 accumulation).
            w_stack = jnp.stack([w1.reshape(K, tk, self.emb_ch),
                                 w2.T.reshape(K, tk, self.emb_ch)], axis=0)
            layers.append((w_stack.astype(jnp.bfloat16),
                           b1.reshape(1, -1),
                           b2.reshape(K, 1, tk),
                           tk))
        self.mlp[f'proj_{id}'] = layers

    def __call__(self, inputs, id, num_patches=256, patch_ids=None):
        outputs = []
        pw, half_ = self.patch_w, self.half_

        if patch_ids is None:
            img = inputs[0].astype(jnp.float32)
            B, C, H, W = img.shape
            # host-side random center location (matches random.randint in torch code)
            sh = random.randint(pw, H - pw)
            sw = random.randint(pw, W - pw)
            sample = img[:, :, sh - half_:sh + half_, sw - half_:sw + half_]  # (B,C,pw,pw)

            # getTensorLocs search-window bounds (exclusive ends)
            search_half = self.search_size // 2
            start_h = half_ if sh - search_half - half_ < 0 else sh - search_half
            start_w = half_ if sw - search_half - half_ < 0 else sw - search_half
            end_h = H - half_ if sh + search_half + half_ > H else sh + search_half
            end_w = W - half_ if sw + search_half + half_ > W else sw + search_half
            Nh, Nw = end_h - start_h, end_w - start_w
            assert Nh > 0 and Nw > 0, "empty search window"

            # fixed (compile-once) kernel shapes derived from the static config,
            # padded so stores are (8, 128)-dense.
            nh_fix = _round_up(max(self.search_size, Nh), 8)
            nw_fix = _round_up(max(self.search_size, Nw), 128)

            # pre-materialize pw*pw shifted copies of the crop on the host so the
            # SSD kernel needs no cross-lane shifts (crop is only tens of KB).
            planes = []
            for dh in range(pw):
                for dw in range(pw):
                    planes.append(
                        img[:, :, start_h - half_ + dh:start_h - half_ + dh + Nh,
                                  start_w - half_ + dw:start_w - half_ + dw + Nw])
            crop_sh = jnp.stack(planes, axis=1).reshape(B, pw * pw * C, Nh, Nw)
            crop_sh = jnp.pad(crop_sh,
                              ((0, 0), (0, 0), (0, nh_fix - Nh), (0, nw_fix - Nw)))
            sample_flat = jnp.transpose(sample, (0, 2, 3, 1)).reshape(B, pw * pw * C)

            dist2 = patch_ssd(crop_sh, sample_flat)            # (B, nh_fix, nw_fix)
            dist2 = dist2[:, :Nh, :Nw]

            hs = list(range(start_h, end_h, self.stride))
            ws = list(range(start_w, end_w, self.stride))
            dist2 = dist2[:, ::self.stride, ::self.stride][:, :len(hs), :len(ws)]
            dist2 = dist2.reshape(B, len(hs) * len(ws))
            locs = jnp.asarray([(h, w) for h in hs for w in ws], dtype=jnp.int32)

            N = len(hs) * len(ws)
            assert num_patches <= N, "num_patches exceeds number of candidate patches"
            # TODO(synk): top-k has no clean Pallas-TPU primitive; use lax.top_k on
            # the negated *squared* SSD (sqrt dropped, ordering unchanged).
            _, index = lax.top_k(-dist2, num_patches)          # (B, P)
            patch_ids = locs[index]                            # (B, P, 2)

        if self.use_mlp and f'proj_{id}' not in self.mlp:
            self._create_mlp(patch_ids, inputs, id)

        for feat_id, feat in enumerate(inputs):
            B, C, H, W = feat.shape
            # NOTE: literal 256 matches torch.floor_divide(patch_ids * H, 256).
            feat_patch_loc = (patch_ids * H) // 256
            patch_id = (feat_patch_loc[..., 0] * W + feat_patch_loc[..., 1]).astype(jnp.int32)
            feat_rs = jnp.transpose(feat, (0, 2, 3, 1)).reshape(B, H * W, C).astype(jnp.float32)

            if self.use_mlp:
                w_stack, b1r, b2r, tk = self.mlp[f'proj_{id}'][feat_id]
                # TODO(synk): the per-patch row gather and the final L2 norm run in
                # the JAX wrapper (HBM-side, moves only P*C rows) so the Pallas MLP
                # kernel stays lane-dense and streams its weights exactly once.
                x_g = jnp.take_along_axis(feat_rs, patch_id[..., None], axis=1)  # (B,P,C)
                P = x_g.shape[1]
                y = mlp_project(x_g.reshape(B, P * C), w_stack, b1r, b2r, tk)
                y = y.reshape(B, P, C)
                norm = jnp.sqrt(jnp.sum(y * y, axis=2, keepdims=True))
                x_sample = y / (norm + 1e-7)
            else:
                x_sample = gather_l2norm(patch_id, feat_rs)

            if num_patches == 0:
                # TODO(synk): degenerate branch of the reference (zero-length gather);
                # kept only for signature parity.
                x_sample = jnp.transpose(x_sample, (0, 2, 1)).reshape(
                    B, x_sample.shape[1], H, W)
            outputs.append(x_sample)
        return outputs, patch_ids


if __name__ == "__main__":
    random.seed(0)
    key = jax.random.PRNGKey(0)
    k0, k1 = jax.random.split(key)
    B = 2
    # two feature levels (NCHW); inputs[0] is also the image used for patch sampling
    feat0 = jax.random.normal(k0, (B, 4, 16, 16), dtype=jnp.float32)
    feat1 = jax.random.normal(k1, (B, 8, 8, 8), dtype=jnp.float32)
    inputs = [feat0, feat1]

    # use_mlp=True path: SSD kernel -> top-k -> fused 2-layer MLP kernel
    sampler = PatchSampleNonlocalOneGroup(use_mlp=True, emb_ch=32, patch_w=4, search_size=8)
    outputs, patch_ids = sampler(inputs, id="layer0", num_patches=16)
    for o in outputs:
        jax.block_until_ready(o)
    jax.block_until_ready(patch_ids)
    assert outputs[0].shape == (B, 16, 4) and outputs[1].shape == (B, 16, 8)
    assert patch_ids.shape == (B, 16, 2)

    # use_mlp=False path (re-uses the selected patch_ids): fused DMA-gather + L2 norm
    sampler_nomlp = PatchSampleNonlocalOneGroup(use_mlp=False, emb_ch=32, patch_w=4, search_size=8)
    outputs2, _ = sampler_nomlp(inputs, id="layer0", num_patches=16, patch_ids=patch_ids)
    for o in outputs2:
        jax.block_until_ready(o)
    assert outputs2[0].shape == (B, 16, 4) and outputs2[1].shape == (B, 16, 8)

    print("KERNEL_OK")
</pallas_src>

<mosaic_0001>
module attributes {stable_mosaic.version = 11 : i64} {
  func.func @_ssd_kernel(%arg0: i32, %arg1: memref<2x64xf32, #tpu.memory_space<smem>>, %arg2: memref<1x64x8x128xf32, #tpu.memory_space<vmem>>, %arg3: memref<1x8x128xf32, #tpu.memory_space<vmem>>) attributes {dimension_semantics = [#tpu.dimension_semantics<parallel>], iteration_bounds = array<i64: 2>, scalar_prefetch = 1 : i64, scratch_operands = 0 : i64, tpu.core_type = #tpu.core_type<tc>, window_params = [{transform_indices = @transform_0, window_bounds = array<i64: 1, 64, 8, 128>}, {transform_indices = @transform_1, window_bounds = array<i64: 1, 8, 128>}]} {
    %cst = arith.constant 0.000000e+00 : f32
    %0 = vector.broadcast %cst : f32 to vector<8x128xf32>
    %c0_i32 = arith.constant 0 : i32
    %c0_i32_0 = arith.constant 0 : i32
    %c64_i32 = arith.constant 64 : i32
    %1 = arith.addi %c0_i32_0, %c64_i32 : i32
    %c1_i32 = arith.constant 1 : i32
    %2 = scf.for %arg4 = %c0_i32_0 to %1 step %c1_i32 iter_args(%arg5 = %0) -> (vector<8x128xf32>)  : i32 {
      %c0_i32_4 = arith.constant 0 : i32
      %c0_i32_5 = arith.constant 0 : i32
      %c0_i32_6 = arith.constant 0 : i32
      %6 = tpu.memref_slice %arg2[%c0_i32, %c0_i32_4, %c0_i32_5, %c0_i32_6] : memref<1x64x8x128xf32, #tpu.memory_space<vmem>> -> memref<1x64x8x128xf32, #tpu.memory_space<vmem>>
      %7 = tpu.memref_squeeze %6 : memref<1x64x8x128xf32, #tpu.memory_space<vmem>> -> memref<64x8x128xf32, #tpu.memory_space<vmem>>
      %8 = arith.index_cast %arg4 : i32 to index
      %c0_7 = arith.constant 0 : index
      %c0_8 = arith.constant 0 : index
      %9 = vector.load %7[%8, %c0_7, %c0_8] : memref<64x8x128xf32, #tpu.memory_space<vmem>>, vector<1x8x128xf32>
      %10 = vector.shape_cast %9 : vector<1x8x128xf32> to vector<8x128xf32>
      %11 = arith.index_cast %arg0 : i32 to index
      %12 = arith.index_cast %arg4 : i32 to index
      %13 = memref.load %arg1[%11, %12] : memref<2x64xf32, #tpu.memory_space<smem>>
      %14 = vector.broadcast %13 : f32 to vector<8x128xf32>
      %15 = arith.subf %10, %14 : vector<8x128xf32>
      %16 = arith.mulf %15, %15 : vector<8x128xf32>
      %17 = arith.addf %arg5, %16 : vector<8x128xf32>
      scf.yield %17 : vector<8x128xf32>
    }
    %c64_i32_1 = arith.constant 64 : i32
    %c0 = arith.constant 0 : index
    %c0_2 = arith.constant 0 : index
    %c0_3 = arith.constant 0 : index
    %3 = vector.load %arg3[%c0, %c0_2, %c0_3] : memref<1x8x128xf32, #tpu.memory_space<vmem>>, vector<1x8x128xf32>
    %4 = vector.shape_cast %3 : vector<1x8x128xf32> to vector<8x128xf32>
    %5 = vector.shape_cast %2 : vector<8x128xf32> to vector<1x8x128xf32>
    tpu.vector_store %arg3[%c0, %c0_2, %c0_3], %5 {strides = array<i32>} : memref<1x8x128xf32, #tpu.memory_space<vmem>>, vector<1x8x128xf32>,
    return
  }
  func.func @transform_0(%arg0: i32, %arg1: memref<2x64xf32, #tpu.memory_space<smem>>) -> (i32, i32, i32, i32) {
    %c0_i32 = arith.constant 0 : i32
    %c0_i32_0 = arith.constant 0 : i32
    %c0_i32_1 = arith.constant 0 : i32
    %c0_i32_2 = arith.constant 0 : i32
    return %arg0, %c0_i32, %c0_i32_0, %c0_i32_1 : i32, i32, i32, i32
  }
  func.func @transform_1(%arg0: i32, %arg1: memref<2x64xf32, #tpu.memory_space<smem>>) -> (i32, i32, i32) {
    %c0_i32 = arith.constant 0 : i32
    %c0_i32_0 = arith.constant 0 : i32
    %c0_i32_1 = arith.constant 0 : i32
    return %arg0, %c0_i32, %c0_i32_0 : i32, i32, i32
  }
}

</mosaic_0001>

<bundles_post_ra>
// kernel: tpu_custom_call.1
= control target key start
LH: loop header
LB: loop body
LE: loop exit
PB: predicated region body
PF: predicated region fallthrough
CT: control target
= control target key end

     0   :  { %s474_s12 = smov [#allocation3]   ;;  %s631_s0 = inlined_call_operand.hbm [shape: f32[2,64], index: 0, kind: input, shape index: {}]   ;;  %s632_s1 = inlined_call_operand.hbm [shape: f32[2,64,8,128], index: 1, kind: input, shape index: {}]   ;;  %s633_s2 = inlined_call_operand.hbm [shape: f32[2,8,128], index: 2, kind: output, shape index: {}]  }
   0x1   :  { %s8_s11 = sshll.u32 %s631_s0, 4  ;;  %s9_s11 = int_to_ptr.hbm [resolvable:$true] %s8_s11 }
   0x2   :  { %11 = dma.hbm_to_smem %s9_s11, 32, %s474_s12, [#allocation2] }
   0x3   :  { %440 = dma.done.wait [#allocation2], 32 }
   0x4   :  { %441 = vsyncadd [#allocation2], 4294967264 }
   0x5   :  { %14 = sfence }
   0x6   :  { %15 = vsyncpa [#allocation5], 0 }
   0x7   :  { %17 = vsyncpa [#allocation5 + $0x1], 0 }
   0x8   :  { %18 = vsyncpa [#allocation6], 0 }
   0x9   :  { %20 = vsyncpa [#allocation6 + $0x1], 0  ;;  %s495_s13 = smov 0   ;;  %s497_s14 = smov 0  }
   0xa   :  { %s499_s15 = smov 0   ;;  %s501_s16 = smov 0  }
   0xb LB: > { %s516_s0 = sadd.s32 4294967295, %s464_s16   ;;  %s265_s17 = sadd.s32 4294967294, %s464_s16   ;;  %s464_s16 = sphi %s501_s16, %s643_s16   ;;  %s460_s15 = sphi %s499_s15, %s642_s15   ;;  %s456_s14 = sphi %s497_s14, %s641_s14   ;;  %s452_s13 = sphi %s495_s13, %s640_s13  }
   0xc   : > { %s520_s18 = sadd.s32 1, %s464_s16   ;;  %s33_s19 = sadd.s32 1, %s460_s15 }
   0xd   : > { %s30_s20 = ssub.s32 %s464_s16, %s520_s18  ;;  %p40_p0 = scmp.ne.s32.totalorder %s460_s15, %s456_s14 }
   0xe   : > { %p31_p1 = scmp.eq.s32.totalorder %s30_s20, 0  ;;  %p41_p2 = scmp.eq.s32.totalorder %s464_s16, 0 }
   0xf   : > { %p46_p3 = scmp.ne.s32.totalorder %s456_s14, %s452_s13  ;;  %p47_p4 = scmp.eq.s32.totalorder %s516_s0, 0 }
  0x10   : > { %s532_s21 = scalar_select %p31_p1, %s460_s15, %s33_s19  }
  0x11   : > { %p534_p5 = por %p41_p2, %p40_p0  ;;  %p538_p6 = por %p47_p4, %p46_p3 }
  0x12   : > { %p70_p7 = scmp.eq.s32.totalorder %s516_s0, 1  ;;  %p76_p8 = scmp.eq.s32.totalorder %s265_s17, 1 }
  0x13   : > { %p293_p10 = scmp.lt.s32.totalorder %s464_s16, 2  ;;  %s96_s26 = sand.u32 1, %s460_s15  }
  0x14   : > { %p545_p11 = por %p70_p7, %p40_p0  ;;  %p549_p12 = por %p76_p8, %p46_p3 }
  0x15   : > { %s280_s27 = sshll.u32 %s464_s16, 9  ;;  %s268_s28 = sshll.u32 %s96_s26, 9 }
  0x16   : > { %s105_s3 = scalar_lea.hbm %s632_s1, %s280_s27  ;;  %s100_s5 = scalar_lea.vmem [#allocation4], %s268_s28 }
  0x17   : > { %s106_s4 = sshll.u32 %s105_s3, 4  ;;  %s108_s6 = sshll.u32 %s100_s5, 4  ;;  %s107_s4 = int_to_ptr.hbm [resolvable:$true] %s106_s4  ;;  %s109_s6 = int_to_ptr.vmem [resolvable:$true] %s108_s6 }
  0x18   : > { %p560_p13 = pnand %p293_p10, %p534_p5  ;;  %p271_p0 = scmp.ge.s32.totalorder %s464_s16, 1 }
  0x19   : > { %p116_p1 = scmp.lt.s32.totalorder %s464_s16, 3  ;;  %s97_s8 = scalar_lea.sflag [#allocation5], %s96_s26 }
  0x1a   : > { %s358_s9 = sshra.s32 %s107_s4, 4  ;;  %p362_p3 = pneg %p560_p13  ;;  %s359_s9 = int_to_ptr.hbm [resolvable:$true] %s358_s9 }
  0x1b   : > { %s360_s10 = scalar_lea.hbm %s359_s9, 512  ;;  %s365_s17 = scalar_lea.hbm %s632_s1, 1024 }
  0x1c   : > { %p361_p2 = scmp.ne.s32.totalorder %s359_s9, %s360_s10  ;;  %p366_p5 = scmp.lt.s32.totalorder %s359_s9, %s632_s1 }
  0x1d   : > { %p367_p8 = scmp.lt.s32.totalorder %s365_s17, %s360_s10 }
  0x1e   : > { %p363_p4 = pnand %p362_p3, %p361_p2 }
  0x1f   : > { %p368_p10 = por %p367_p8, %p366_p5 }
  0x20   : > { %p364_p7 = pneg %p363_p4 }
  0x22   : > { %p369_p9 = pnand %p368_p10, %p364_p7 }
  0x24   : > { %372 = shalt.err (!%p369_p9)
}
  0x25   : > { %s475_s22 = smov 128   ;;  %s476_s26 = smov 8  }
  0x26   : > { %288 = dma.hbm_to_vmem [thread:$0]  (!%p560_p13), %s107_s4, 8192, %s109_s6, %s97_s8, %s475_s22, %s475_s22, %s476_s26  }
  0x27   : > { %p117_p2 = pnand %p271_p0, %p116_p1 }
  0x28   : > { %s581_s27 = sand.u32 (!%p117_p2), 1, %s456_s14  }
  0x29   : > { %120 = sbr.rel (%p117_p2) target bundleno = 69 (0x45), region = 24  ;;  %s272_s28 = sshll.u32 (!%p117_p2), %s581_s27, 9 }
  0x2a   : > { %s123_s29 = scalar_lea.sflag (!%p117_p2), [#allocation5], %s581_s27  ;;  %s585_s30 = scalar_lea.vmem (!%p117_p2), [#allocation4], %s272_s28 }
  0x2e   : > { %443 = dma.done.wait (%p538_p6), %s123_s29, 8192  }
  0x2f   : > { %445 = vsyncadd (%p538_p6), %s123_s29, 4294959104  ;;  %s273_s3 = sshll.u32 %s581_s27, 3  ;;  %v466_v0 = vmov 0.0   ;;  %s470_s5 = smov 0  }
  0x30   : > { %s592_s4 = scalar_lea.vmem [#allocation7], %s273_s3 }
  0x31 LB: >> { %s156_s6 = sshra.s32 %s472_s5, 7  ;;  %s274_s7 = sshll.u32 %s472_s5, 3  ;;  %s472_s5 = sphi %s470_s5, %s151_s5   ;;  %v468_v0 = vphi %v466_v0, %v467_v0  }
  0x32   : >> { %s158_s8 = sadd.s32 %s516_s0, %s156_s6  ;;  %s161_s10 = sand.u32 127, %s472_s5 }
  0x33   : >> { %s275_s9 = sshll.u32 %s158_s8, 7  ;;  %s154_s12 = scalar_lea.vmem %s585_s30, %s274_s7 [#allocation4] }
  0x34   : >> { %s162_s11 = sadd.s32 %s275_s9, %s161_s10  ;;  %v155_v1 = vld [vmem:[%s154_s12] sm:$0xff]  ;;  %s151_s5 = sadd.s32 1, %s472_s5  }
  0x35   : >> { %s163_s23 = sld [smem:[#allocation3 + %s162_s11]]  ;;  %p148_p6 = scmp.ge.s32.totalorder %s151_s5, 64  }
  0x36   : > { %s277_s17 = sshll.u32 (%p148_p6), %s516_s0, 3  ;;  %s182_s26 = sshll.u32 (%p148_p6), %s592_s4, 4  ;;  %s183_s26 = int_to_ptr.vmem [resolvable:$true] %s182_s26 }
  0x37   : > { %s180_s22 = scalar_lea.hbm (%p148_p6), %s633_s2, %s277_s17  ;;  %s170_s29 = scalar_lea.sflag (%p148_p6), [#allocation6], %s581_s27 }
  0x38   : > { %s184_s28 = sshll.u32 (%p148_p6), %s180_s22, 4  ;;  %s408_s0 = scalar_lea.hbm (%p148_p6), %s633_s2, 16  ;;  %s185_s28 = int_to_ptr.hbm [resolvable:$true] %s184_s28 }
  0x39   : > { %s402_s3 = sshra.s32 (%p148_p6), %s185_s28, 4  ;;  %s403_s3 = int_to_ptr.hbm [resolvable:$true] %s402_s3 }
  0x3a   : > { %s404_s5 = scalar_lea.hbm (%p148_p6), %s403_s3, 8  ;;  %p409_p1 = scmp.lt.s32.totalorder (%p148_p6), %s403_s3, %s633_s2 }
  0x3b   : >> { %v164_v2 = vstv %s163_s23  ;;  %p405_p9 = scmp.ne.s32.totalorder (%p148_p6), %s403_s3, %s404_s5  ;;  %p410_p3 = scmp.lt.s32.totalorder (%p148_p6), %s408_s0, %s404_s5 }
  0x3c   : >> { %v165_v3 = vsub.f32 %v155_v1, %v164_v2 }
  0x3d   : > { %p406_p13 = pnand (%p148_p6), %p405_p9, %p545_p11  ;;  %p411_p4 = por (%p148_p6), %p410_p3, %p409_p1 }
  0x3e   : >> { %v166_v4 = vmul.f32 %v165_v3, %v165_v3  ;;  %150 = sbr.rel (!%p148_p6) target bundleno = 49 (0x31), region = 77 }
  0x3f   : > { %p407_p0 = pneg (%p148_p6), %p406_p13 }
  0x40   : >> { %v167_v5 = vadd.f32 %v468_v0, %v166_v4  }
  0x41   : > { %p412_p7 = pnand (%p148_p6), %p411_p4, %p407_p0 }
  0x42   : >> { %v467_v0 = vmov %v167_v5   ;;  %168 = vst [vmem:[%s592_s4] sm:$0xff] (%p148_p6), %v167_v5 }
  0x43   : > { %415 = shalt.err (!%p412_p7)
}
  0x44   : > { %283 = dma.vmem_to_hbm [thread:$0]  (%p545_p11), %s183_s26, 128, %s185_s28, %s170_s29  }
  0x45 PF: > { %s196_s27 = sand.u32 1, %s452_s13   ;;  %p639_p5 = scmp.ge.s32.totalorder %s464_s16, 2 }
  0x46   : > { %s197_s4 = scalar_lea.sflag [#allocation6], %s196_s27 }
  0x47   : > { %p290_p8 = pnand %p639_p5, %p549_p12 }
  0x49   : > { %p291_p10 = pneg %p290_p8 }
  0x4b   : > { %447 = dma.done.wait (%p291_p10), %s197_s4, 128  }
  0x4c   : > { %449 = vsyncadd (%p291_p10), %s197_s4, 4294967168  ;;  %p23_p2 = scmp.ge.s32.totalorder %s520_s18, 4   ;;  %s640_s13 = smov %s456_s14 }
  0x4d   : > { %s641_s14 = smov %s460_s15  ;;  %s642_s15 = smov %s532_s21 }
  0x4e   : > { %s643_s16 = smov %s520_s18  ;;  %25 = sbr.rel (!%p23_p2) target bundleno = 11 (0xb), region = 88 }
  0x53   :  { %203 = vsyncpa [#allocation5], 1 }
  0x54   :  { %205 = vsyncpa [#allocation5 + $0x1], 1 }
  0x55   :  { %206 = vsyncpa [#allocation6], 1 }
  0x56   :  { %208 = vsyncpa [#allocation6 + $0x1], 1 }

</bundles_post_ra>
